<compile_context>
chip_gen: v7x
topology: tpu7x:2x2x1
jax: 0.10.0
libtpu: 0.0.40
codegen_flags: <defaults>
</compile_context>

<pallas_src>
import jax
import jax.numpy as jnp
from jax.experimental import pallas as pl
from jax.experimental.pallas import tpu as pltpu


def mlp_kernel(x_ref, w1_ref, b1_ref, w2_ref, b2_ref, out_ref):
    # x_ref: (TB, Din); w1_ref: (Din, Dh); b1_ref: (1, Dh)
    # w2_ref: (Dh, Dout_p); b2_ref: (1, Dout_p); out_ref: (TB, Dout_p)
    x = x_ref[...]

    # ---- layer_input: x @ W1 + b1, then ReLU (dropout == identity, eval) ----
    h = jnp.dot(x, w1_ref[...], preferred_element_type=jnp.float32)
    h = jnp.maximum(h + b1_ref[...], 0.0)

    # ---- layer_hidden: h @ W2 + b2 (padded cols carry a -1e30 bias) ----
    logits = jnp.dot(h, w2_ref[...], preferred_element_type=jnp.float32)
    logits = logits + b2_ref[...]

    # ---- numerically stable log_softmax over the class axis ----
    m = jnp.max(logits, axis=1, keepdims=True)
    shifted = logits - m
    lse = jnp.log(jnp.sum(jnp.exp(shifted), axis=1, keepdims=True))
    out_ref[...] = (shifted - lse).astype(out_ref.dtype)


def mlp_forward(x_nchw, w1, b1, w2, b2):
    """x_nchw: (N, C, H, W); w1: (Din, Dh); b1: (Dh,); w2: (Dh, Dout); b2: (Dout,).

    Matches MLP.forward: flatten -> Linear -> Dropout(eval) -> ReLU -> Linear
    -> log_softmax(dim=1). Returns (N, Dout) float32.
    """
    N = x_nchw.shape[0]
    din = x_nchw.shape[1] * x_nchw.shape[2] * x_nchw.shape[3]
    dh = w1.shape[1]
    dout = w2.shape[1]

    LANE, SUB = 128, 8

    xf = x_nchw.reshape(N, din).astype(jnp.float32)

    # ---- batch padding / tiling (sublane aligned, "parallel" grid) ----
    block_b = 256 if N >= 256 else pl.cdiv(N, SUB) * SUB
    n_pad = pl.cdiv(N, block_b) * block_b
    if n_pad != N:
        xf = jnp.pad(xf, ((0, n_pad - N), (0, 0)))

    # ---- lane-dense output: pad class dim up to a multiple of 128 ----
    dout_p = pl.cdiv(dout, LANE) * LANE
    w2_p = jnp.zeros((dh, dout_p), jnp.float32).at[:, :dout].set(
        w2.astype(jnp.float32))
    # padded classes get a huge negative bias -> exp() underflows to 0 in the
    # log-softmax denominator, so real-class outputs are unaffected.
    b2_p = jnp.full((1, dout_p), -1e30, jnp.float32).at[0, :dout].set(
        b2.astype(jnp.float32))

    w1f = w1.astype(jnp.float32)
    b1f = b1.reshape(1, dh).astype(jnp.float32)

    grid = (n_pad // block_b,)

    out_padded = pl.pallas_call(
        mlp_kernel,
        out_shape=jax.ShapeDtypeStruct((n_pad, dout_p), jnp.float32),
        grid_spec=pltpu.PrefetchScalarGridSpec(
            num_scalar_prefetch=0,
            grid=grid,
            in_specs=[
                pl.BlockSpec((block_b, din), lambda i: (i, 0)),   # x tile
                pl.BlockSpec((din, dh), lambda i: (0, 0)),        # W1
                pl.BlockSpec((1, dh), lambda i: (0, 0)),          # b1
                pl.BlockSpec((dh, dout_p), lambda i: (0, 0)),     # W2 (padded)
                pl.BlockSpec((1, dout_p), lambda i: (0, 0)),      # b2 (padded)
            ],
            out_specs=pl.BlockSpec((block_b, dout_p), lambda i: (i, 0)),
        ),
        compiler_params=pltpu.CompilerParams(
            dimension_semantics=("parallel",)),
    )(xf, w1f, b1f, w2_p, b2_p)

    return out_padded[:N, :dout]


def _reference_mlp(x_nchw, w1, b1, w2, b2):
    N = x_nchw.shape[0]
    xf = x_nchw.reshape(N, -1).astype(jnp.float32)
    h = jnp.maximum(xf @ w1 + b1, 0.0)          # dropout is identity in eval
    logits = h @ w2 + b2
    return jax.nn.log_softmax(logits, axis=1)


if __name__ == "__main__":
    # PyTorch-equivalent input: NCHW (2, 4, 16, 16) -> dim_in = 4*16*16 = 1024.
    N, C, H, W = 2, 4, 16, 16
    dim_in = C * H * W
    dim_hidden = 128
    dim_out = 10

    key = jax.random.PRNGKey(0)
    ks = jax.random.split(key, 5)

    x = jax.random.normal(ks[0], (N, C, H, W), jnp.float32)
    # Linear weights stored as (in, out) for the kernel (== PyTorch W.T).
    w1 = jax.random.normal(ks[1], (dim_in, dim_hidden), jnp.float32) * 0.02
    b1 = jax.random.normal(ks[2], (dim_hidden,), jnp.float32) * 0.1
    w2 = jax.random.normal(ks[3], (dim_hidden, dim_out), jnp.float32) * 0.1
    b2 = jax.random.normal(ks[4], (dim_out,), jnp.float32) * 0.1

    out = mlp_forward(x, w1, b1, w2, b2)
    out = jax.block_until_ready(out)
    assert out.shape == (N, dim_out)

    ref = _reference_mlp(x, w1, b1, w2, b2)
    if not jnp.allclose(out, ref, atol=2e-3, rtol=2e-3):
        raise AssertionError("Pallas kernel does not match reference")
    # log_softmax rows must (log-)sum to 1.
    if not jnp.allclose(jnp.sum(jnp.exp(out), axis=1), 1.0, atol=1e-4):
        raise AssertionError("log_softmax rows do not normalize")

    print("KERNEL_OK")
</pallas_src>

<mosaic_0001>
module attributes {stable_mosaic.version = 11 : i64} {
  func.func @mlp_kernel(%arg0: i32, %arg1: memref<8x1024xf32, #tpu.memory_space<vmem>>, %arg2: memref<1024x128xf32, #tpu.memory_space<vmem>>, %arg3: memref<1x128xf32, #tpu.memory_space<vmem>>, %arg4: memref<128x128xf32, #tpu.memory_space<vmem>>, %arg5: memref<1x128xf32, #tpu.memory_space<vmem>>, %arg6: memref<8x128xf32, #tpu.memory_space<vmem>>) attributes {dimension_semantics = [#tpu.dimension_semantics<parallel>], iteration_bounds = array<i64: 1>, scalar_prefetch = 0 : i64, scratch_operands = 0 : i64, tpu.core_type = #tpu.core_type<tc>, window_params = [{transform_indices = @transform_0, window_bounds = array<i64: 8, 1024>}, {pipeline_mode = #tpu.pipeline_mode<synchronous>, transform_indices = @transform_1, window_bounds = array<i64: 1024, 128>}, {pipeline_mode = #tpu.pipeline_mode<synchronous>, transform_indices = @transform_2, window_bounds = array<i64: 1, 128>}, {pipeline_mode = #tpu.pipeline_mode<synchronous>, transform_indices = @transform_3, window_bounds = array<i64: 128, 128>}, {pipeline_mode = #tpu.pipeline_mode<synchronous>, transform_indices = @transform_4, window_bounds = array<i64: 1, 128>}, {transform_indices = @transform_5, window_bounds = array<i64: 8, 128>}]} {
    %c0 = arith.constant 0 : index
    %c0_0 = arith.constant 0 : index
    %0 = vector.load %arg1[%c0, %c0_0] : memref<8x1024xf32, #tpu.memory_space<vmem>>, vector<8x1024xf32>
    %c0_1 = arith.constant 0 : index
    %c0_2 = arith.constant 0 : index
    %1 = vector.load %arg2[%c0_1, %c0_2] : memref<1024x128xf32, #tpu.memory_space<vmem>>, vector<1024x128xf32>
    %cst = arith.constant dense<0.000000e+00> : vector<8x128xf32>
    %2 = tpu.matmul %0, %1, %cst {dimension_numbers = #tpu.dot_dimension_numbers<[1], [0], [0], [1], [0, 0, 1, 1], [], []>} : vector<8x1024xf32>, vector<1024x128xf32>, vector<8x128xf32> -> vector<8x128xf32>
    %c0_3 = arith.constant 0 : index
    %c0_4 = arith.constant 0 : index
    %3 = vector.load %arg3[%c0_3, %c0_4] : memref<1x128xf32, #tpu.memory_space<vmem>>, vector<1x128xf32>
    %4 = vector.broadcast %3 : vector<1x128xf32> to vector<8x128xf32>
    %5 = arith.addf %2, %4 : vector<8x128xf32>
    %cst_5 = arith.constant 0.000000e+00 : f32
    %6 = vector.broadcast %cst_5 : f32 to vector<8x128xf32>
    %7 = arith.maximumf %5, %6 : vector<8x128xf32>
    %c0_6 = arith.constant 0 : index
    %c0_7 = arith.constant 0 : index
    %8 = vector.load %arg4[%c0_6, %c0_7] : memref<128x128xf32, #tpu.memory_space<vmem>>, vector<128x128xf32>
    %cst_8 = arith.constant dense<0.000000e+00> : vector<8x128xf32>
    %9 = tpu.matmul %7, %8, %cst_8 {dimension_numbers = #tpu.dot_dimension_numbers<[1], [0], [0], [1], [0, 0, 1, 1], [], []>} : vector<8x128xf32>, vector<128x128xf32>, vector<8x128xf32> -> vector<8x128xf32>
    %c0_9 = arith.constant 0 : index
    %c0_10 = arith.constant 0 : index
    %10 = vector.load %arg5[%c0_9, %c0_10] : memref<1x128xf32, #tpu.memory_space<vmem>>, vector<1x128xf32>
    %11 = vector.broadcast %10 : vector<1x128xf32> to vector<8x128xf32>
    %12 = arith.addf %9, %11 : vector<8x128xf32>
    %cst_11 = arith.constant dense<0xFF800000> : vector<8xf32>
    %13 = vector.multi_reduction <maximumf>, %12, %cst_11 [1] : vector<8x128xf32> to vector<8xf32>
    %14 = vector.shape_cast %13 : vector<8xf32> to vector<8x1xf32>
    %15 = vector.broadcast %14 : vector<8x1xf32> to vector<8x128xf32>
    %16 = arith.subf %12, %15 : vector<8x128xf32>
    %17 = math.exp %16 : vector<8x128xf32>
    %cst_12 = arith.constant dense<0.000000e+00> : vector<8xf32>
    %18 = vector.multi_reduction <add>, %17, %cst_12 [1] : vector<8x128xf32> to vector<8xf32>
    %19 = vector.shape_cast %18 : vector<8xf32> to vector<8x1xf32>
    %20 = math.log %19 : vector<8x1xf32>
    %21 = vector.broadcast %20 : vector<8x1xf32> to vector<8x128xf32>
    %22 = arith.subf %16, %21 : vector<8x128xf32>
    %c0_13 = arith.constant 0 : index
    %c0_14 = arith.constant 0 : index
    %23 = vector.load %arg6[%c0_13, %c0_14] : memref<8x128xf32, #tpu.memory_space<vmem>>, vector<8x128xf32>
    tpu.vector_store %arg6[%c0_13, %c0_14], %22 {strides = array<i32>} : memref<8x128xf32, #tpu.memory_space<vmem>>, vector<8x128xf32>,
    return
  }
  func.func @transform_0(%arg0: i32) -> (i32, i32) {
    %c0_i32 = arith.constant 0 : i32
    %c0_i32_0 = arith.constant 0 : i32
    return %arg0, %c0_i32 : i32, i32
  }
  func.func @transform_1(%arg0: i32) -> (i32, i32) {
    %c0_i32 = arith.constant 0 : i32
    %c0_i32_0 = arith.constant 0 : i32
    %c0_i32_1 = arith.constant 0 : i32
    return %c0_i32, %c0_i32_0 : i32, i32
  }
  func.func @transform_2(%arg0: i32) -> (i32, i32) {
    %c0_i32 = arith.constant 0 : i32
    %c0_i32_0 = arith.constant 0 : i32
    %c0_i32_1 = arith.constant 0 : i32
    return %c0_i32, %c0_i32_0 : i32, i32
  }
  func.func @transform_3(%arg0: i32) -> (i32, i32) {
    %c0_i32 = arith.constant 0 : i32
    %c0_i32_0 = arith.constant 0 : i32
    %c0_i32_1 = arith.constant 0 : i32
    return %c0_i32, %c0_i32_0 : i32, i32
  }
  func.func @transform_4(%arg0: i32) -> (i32, i32) {
    %c0_i32 = arith.constant 0 : i32
    %c0_i32_0 = arith.constant 0 : i32
    %c0_i32_1 = arith.constant 0 : i32
    return %c0_i32, %c0_i32_0 : i32, i32
  }
  func.func @transform_5(%arg0: i32) -> (i32, i32) {
    %c0_i32 = arith.constant 0 : i32
    %c0_i32_0 = arith.constant 0 : i32
    return %arg0, %c0_i32 : i32, i32
  }
}

</mosaic_0001>

<bundles_post_ra>
// kernel: tpu_custom_call.1
= control target key start
LH: loop header
LB: loop body
LE: loop exit
PB: predicated region body
PF: predicated region fallthrough
CT: control target
= control target key end

     0   :  { %10 = vsyncpa [#allocation3], 0  ;;  %s1156_s0 = inlined_call_operand.hbm [shape: f32[8,1024], index: 0, kind: input, shape index: {}]   ;;  %s1157_s1 = inlined_call_operand.hbm [shape: f32[1024,128], index: 1, kind: input, shape index: {}]   ;;  %s1158_s2 = inlined_call_operand.vmem [shape: f32[1,128], index: 2, kind: input, shape index: {}]   ;;  %s1159_s3 = inlined_call_operand.hbm [shape: f32[128,128], index: 3, kind: input, shape index: {}]   ;;  %s1160_s4 = inlined_call_operand.vmem [shape: f32[1,128], index: 4, kind: input, shape index: {}]   ;;  %s1161_s5 = inlined_call_operand.hbm [shape: f32[8,128], index: 5, kind: output, shape index: {}]  }
   0x1   :  { %11 = vsyncpa [#allocation6], 0 }
   0x2   :  { %12 = vsyncpa [#allocation4], 0  ;;  %s1057_s18 = smov [#allocation5]   ;;  %s963_s22 = scalar_lea.hbm %s1157_s1, 16384 }
   0x3   :  { %s28_s19 = sshll.u32 %s1057_s18, 4  ;;  %p964_p0 = scmp.ne.s32.totalorder %s1157_s1, %s963_s22  ;;  %s29_s19 = int_to_ptr.vmem [resolvable:$true] %s28_s19 }
   0x4   :  { %p967_p1 = scmp.lt.u32.totalorder %s963_s22, %s1157_s1 }
   0x6   :  { %p969_p2 = pnand %p967_p1, %p964_p0 }
   0x8   :  { %972 = shalt.err (!%p969_p2)
}
   0x9   :  { %s973_s27 = scalar_lea.vmem %s29_s19, 16384  ;;  %p978_p4 = scmp.lt.s32.totalorder %s29_s19, %s29_s19 }
   0xa   :  { %p974_p3 = scmp.ne.s32.totalorder %s29_s19, %s973_s27  ;;  %p979_p5 = scmp.lt.s32.totalorder %s973_s27, %s973_s27 }
   0xc   :  { %p980_p6 = por %p979_p5, %p978_p4 }
   0xe   :  { %p981_p7 = pnand %p980_p6, %p974_p3 }
  0x10   :  { %984 = shalt.err (!%p981_p7)
}
  0x11   :  { %s1058_s28 = smov 128   ;;  %s1059_s29 = smov 8  }
  0x12   :  { %34 = dma.hbm_to_vmem [thread:$0]  %s1157_s1, 16384, %s29_s19, [#allocation6], %s1058_s28, %s1058_s28, %s1059_s29  }
  0x13   :  { %s1060_s7 = smov [#allocation2]   ;;  %s1061_s9 = smov [#allocation7]  }
  0x14   :  { %s19_s8 = sshll.u32 %s1060_s7, 4  ;;  %s42_s10 = sshll.u32 %s1061_s9, 4  ;;  %s20_s8 = int_to_ptr.vmem [resolvable:$true] %s19_s8  ;;  %s43_s10 = int_to_ptr.vmem [resolvable:$true] %s42_s10 }
  0x15   :  { %s985_s13 = scalar_lea.hbm %s1156_s0, 1024 }
  0x16   :  { %p986_p8 = scmp.ne.s32.totalorder %s1156_s0, %s985_s13  ;;  %p989_p9 = scmp.lt.u32.totalorder %s985_s13, %s1156_s0 }
  0x18   :  { %p991_p10 = pnand %p989_p9, %p986_p8 }
  0x1a   :  { %994 = shalt.err (!%p991_p10)
}
  0x1b   :  { %s995_s1 = scalar_lea.vmem %s20_s8, 1024  ;;  %p1000_p12 = scmp.lt.s32.totalorder %s20_s8, %s20_s8 }
  0x1c   :  { %p996_p11 = scmp.ne.s32.totalorder %s20_s8, %s995_s1  ;;  %p1001_p13 = scmp.lt.s32.totalorder %s995_s1, %s995_s1 }
  0x1e   :  { %p1002_p0 = por %p1001_p13, %p1000_p12 }
  0x20   :  { %p1003_p1 = pnand %p1002_p0, %p996_p11 }
  0x22   :  { %1006 = shalt.err (!%p1003_p1)
}
  0x23   :  { %22 = dma.hbm_to_vmem [thread:$0]  %s1156_s0, 1024, %s20_s8, [#allocation3]  }
  0x24   :  { %s1007_s22 = scalar_lea.hbm %s1159_s3, 2048 }
  0x25   :  { %p1008_p2 = scmp.ne.s32.totalorder %s1159_s3, %s1007_s22  ;;  %p1011_p3 = scmp.lt.u32.totalorder %s1007_s22, %s1159_s3 }
  0x27   :  { %p1013_p4 = pnand %p1011_p3, %p1008_p2 }
  0x29   :  { %1016 = shalt.err (!%p1013_p4)
}
  0x2a   :  { %s1017_s27 = scalar_lea.vmem %s43_s10, 2048  ;;  %p1022_p6 = scmp.lt.s32.totalorder %s43_s10, %s43_s10 }
  0x2b   :  { %p1018_p5 = scmp.ne.s32.totalorder %s43_s10, %s1017_s27  ;;  %p1023_p7 = scmp.lt.s32.totalorder %s1017_s27, %s1017_s27 }
  0x2d   :  { %p1024_p8 = por %p1023_p7, %p1022_p6 }
  0x2f   :  { %p1025_p9 = pnand %p1024_p8, %p1018_p5 }
  0x31   :  { %1028 = shalt.err (!%p1025_p9)
}
  0x32   :  { %48 = dma.hbm_to_vmem [thread:$0]  %s1159_s3, 2048, %s43_s10, [#allocation6], %s1058_s28, %s1058_s28, %s1059_s29  }
  0x33   :  { %1051 = dma.done.wait [#allocation3], 1024  }
  0x34   :  { %1052 = vsyncadd [#allocation3], 4294966272 }
  0x35   :  { %1053 = dma.done.wait [#allocation6], 18432  }
  0x36   :  { %1054 = vsyncadd [#allocation6], 4294948864  ;;  %v84_v0 = vld [vmem:[#allocation5 + $0x80] sm:$0xff]  ;;  %v85_v1 = vld [vmem:[#allocation5 + $0x88] sm:$0xff]  ;;  %vm1063_vm0 = vmmov 0  }
  0x37   :  { %v68_v2 = vld [vmem:[#allocation5] sm:$0xff]  ;;  %v798_v3 = vpack.c.bf16 %v85_v1, %v84_v0  ;;  %v69_v4 = vld [vmem:[#allocation5 + $0x8] sm:$0xff]  ;;  %v86_v11 = vld [vmem:[#allocation5 + $0x90] sm:$0xff] }
  0x38   :  { %v116_v5 = vld [vmem:[#allocation5 + $0x180] sm:$0xff]  ;;  %v117_v6 = vld [vmem:[#allocation5 + $0x188] sm:$0xff]  ;;  %v800_v7 = vpack.c.bf16 %v69_v4, %v68_v2  ;;  %v87_v13 = vld [vmem:[#allocation5 + $0x98] sm:$0xff] }
  0x39   :  { %v830_v8 = vpack.c.bf16 %v117_v6, %v116_v5  ;;  %v100_v9 = vld [vmem:[#allocation5 + $0x100] sm:$0xff]  ;;  %v101_v10 = vld [vmem:[#allocation5 + $0x108] sm:$0xff]  ;;  %799 = vmatprep.subr.bf16.mxu0 %v798_v3  ;;  %v70_v14 = vld [vmem:[#allocation5 + $0x10] sm:$0xff]  ;;  %v802_v16 = vpack.c.bf16 %v87_v13, %v86_v11 }
  0x3a   :  { %v832_v12 = vpack.c.bf16 %v101_v10, %v100_v9  ;;  %v71_v15 = vld [vmem:[#allocation5 + $0x18] sm:$0xff]  ;;  %801 = vmatpush3.bf16.msra.mxu0 %v800_v7  ;;  %v118_v18 = vld [vmem:[#allocation5 + $0x190] sm:$0xff]  ;;  %v88_v23 = vld [vmem:[#allocation5 + $0xa0] sm:$0xff] }
  0x3b   :  { %831 = vmatprep.subr.bf16.mxu1 %v830_v8  ;;  %v804_v17 = vpack.c.bf16 %v71_v15, %v70_v14  ;;  %v119_v19 = vld [vmem:[#allocation5 + $0x198] sm:$0xff]  ;;  %v102_v20 = vld [vmem:[#allocation5 + $0x110] sm:$0xff]  ;;  %v89_v24 = vld [vmem:[#allocation5 + $0xa8] sm:$0xff]  ;;  %803 = vmatprep.subr.bf16.mxu0 %v802_v16 }
  0x3c   :  { %833 = vmatpush3.bf16.msra.mxu1 %v832_v12  ;;  %v834_v21 = vpack.c.bf16 %v119_v19, %v118_v18  ;;  %v103_v22 = vld [vmem:[#allocation5 + $0x118] sm:$0xff]  ;;  %v806_v26 = vpack.c.bf16 %v89_v24, %v88_v23  ;;  %v72_v27 = vld [vmem:[#allocation5 + $0x20] sm:$0xff]  ;;  %v73_v28 = vld [vmem:[#allocation5 + $0x28] sm:$0xff] }
  0x3d   :  { %v836_v25 = vpack.c.bf16 %v103_v22, %v102_v20  ;;  %v120_v29 = vld [vmem:[#allocation5 + $0x1a0] sm:$0xff]  ;;  %v121_v30 = vld [vmem:[#allocation5 + $0x1a8] sm:$0xff]  ;;  %v808_v33 = vpack.c.bf16 %v73_v28, %v72_v27  ;;  %v90_v35 = vld [vmem:[#allocation5 + $0xb0] sm:$0xff] }
  0x3e   :  { %835 = vmatprep.subr.bf16.mxu1 %v834_v21  ;;  %v104_v31 = vld [vmem:[#allocation5 + $0x120] sm:$0xff]  ;;  %v105_v32 = vld [vmem:[#allocation5 + $0x128] sm:$0xff]  ;;  %805 = vmatpush3.bf16.msra.mxu0 %v804_v17  ;;  %v838_v34 = vpack.c.bf16 %v121_v30, %v120_v29  ;;  %v91_v36 = vld [vmem:[#allocation5 + $0xb8] sm:$0xff] }
  0x3f   :  { %v74_v37 = vld [vmem:[#allocation5 + $0x30] sm:$0xff]  ;;  %807 = vmatprep.subr.bf16.mxu0 %v806_v26  ;;  %v840_v38 = vpack.c.bf16 %v105_v32, %v104_v31  ;;  %v810_v39 = vpack.c.bf16 %v91_v36, %v90_v35  ;;  %v75_v40 = vld [vmem:[#allocation5 + $0x38] sm:$0xff]  ;;  %v92_v46 = vld [vmem:[#allocation5 + $0xc0] sm:$0xff] }
  0x40   :  { %837 = vmatpush3.bf16.msra.mxu1 %v836_v25  ;;  %v122_v41 = vld [vmem:[#allocation5 + $0x1b0] sm:$0xff]  ;;  %v123_v42 = vld [vmem:[#allocation5 + $0x1b8] sm:$0xff]  ;;  %v93_v47 = vld [vmem:[#allocation5 + $0xc8] sm:$0xff]  ;;  %v812_v48 = vpack.c.bf16 %v75_v40, %v74_v37 }
  0x41   :  { %839 = vmatprep.subr.bf16.mxu1 %v838_v34  ;;  %v842_v43 = vpack.c.bf16 %v123_v42, %v122_v41  ;;  %v106_v44 = vld [vmem:[#allocation5 + $0x130] sm:$0xff]  ;;  %v107_v45 = vld [vmem:[#allocation5 + $0x138] sm:$0xff]  ;;  %v124_v49 = vld [vmem:[#allocation5 + $0x1c0] sm:$0xff]  ;;  %v814_v52 = vpack.c.bf16 %v93_v47, %v92_v46 }
  0x42   :  { %809 = vmatpush3.bf16.msra.mxu0 %v808_v33  ;;  %v125_v50 = vld [vmem:[#allocation5 + $0x1c8] sm:$0xff]  ;;  %v844_v51 = vpack.c.bf16 %v107_v45, %v106_v44  ;;  %v76_v53 = vld [vmem:[#allocation5 + $0x40] sm:$0xff]  ;;  %v94_v58 = vld [vmem:[#allocation5 + $0xd0] sm:$0xff] }
  0x43   :  { %811 = vmatprep.subr.bf16.mxu0 %v810_v39  ;;  %v77_v54 = vld [vmem:[#allocation5 + $0x48] sm:$0xff]  ;;  %v108_v55 = vld [vmem:[#allocation5 + $0x140] sm:$0xff]  ;;  %v846_v56 = vpack.c.bf16 %v125_v50, %v124_v49  ;;  %v95_v59 = vld [vmem:[#allocation5 + $0xd8] sm:$0xff] }
  0x44   :  { %841 = vmatpush3.bf16.msra.mxu1 %v840_v38  ;;  %v109_v57 = vld [vmem:[#allocation5 + $0x148] sm:$0xff]  ;;  %v126_v60 = vld [vmem:[#allocation5 + $0x1d0] sm:$0xff]  ;;  %v127_v61 = vld [vmem:[#allocation5 + $0x1d8] sm:$0xff]  ;;  %v816_v62 = vpack.c.bf16 %v77_v54, %v76_v53  ;;  %v818_v0 = vpack.c.bf16 %v95_v59, %v94_v58 }
  0x45   :  { %843 = vmatprep.subr.bf16.mxu1 %v842_v43  ;;  %v848_v63 = vpack.c.bf16 %v109_v57, %v108_v55  ;;  %v78_v1 = vld [vmem:[#allocation5 + $0x50] sm:$0xff]  ;;  %v79_v2 = vld [vmem:[#allocation5 + $0x58] sm:$0xff]  ;;  %v850_v4 = vpack.c.bf16 %v127_v61, %v126_v60  ;;  %v96_v6 = vld [vmem:[#allocation5 + $0xe0] sm:$0xff] }
  0x46   :  { %813 = vmatpush3.bf16.msra.mxu0 %v812_v48  ;;  %v110_v3 = vld [vmem:[#allocation5 + $0x150] sm:$0xff]  ;;  %v111_v5 = vld [vmem:[#allocation5 + $0x158] sm:$0xff]  ;;  %v97_v7 = vld [vmem:[#allocation5 + $0xe8] sm:$0xff]  ;;  %v820_v10 = vpack.c.bf16 %v79_v2, %v78_v1 }
  0x47   :  { %815 = vmatprep.subr.bf16.mxu0 %v814_v52  ;;  %v128_v8 = vld [vmem:[#allocation5 + $0x1e0] sm:$0xff]  ;;  %v129_v9 = vld [vmem:[#allocation5 + $0x1e8] sm:$0xff]  ;;  %v852_v13 = vpack.c.bf16 %v111_v5, %v110_v3  ;;  %v822_v14 = vpack.c.bf16 %v97_v7, %v96_v6  ;;  %v98_v19 = vld [vmem:[#allocation5 + $0xf0] sm:$0xff] }
  0x48   :  { %845 = vmatpush3.bf16.msra.mxu1 %v844_v51  ;;  %v80_v11 = vld [vmem:[#allocation5 + $0x60] sm:$0xff]  ;;  %v81_v12 = vld [vmem:[#allocation5 + $0x68] sm:$0xff]  ;;  %v854_v18 = vpack.c.bf16 %v129_v9, %v128_v8  ;;  %v99_v20 = vld [vmem:[#allocation5 + $0xf8] sm:$0xff] }
  0x49   :  { %847 = vmatprep.subr.bf16.mxu1 %v846_v56  ;;  %v112_v15 = vld [vmem:[#allocation5 + $0x160] sm:$0xff]  ;;  %v113_v16 = vld [vmem:[#allocation5 + $0x168] sm:$0xff]  ;;  %v63_v21 = vld [vmem:[#allocation2 + $0x18] sm:$0xff]  ;;  %v824_v24 = vpack.c.bf16 %v81_v12, %v80_v11  ;;  %v826_v26 = vpack.c.bf16 %v99_v20, %v98_v19 }
  0x4a   :  { %817 = vmatpush3.bf16.msra.mxu0 %v816_v62  ;;  %v61_v17 = vld [vmem:[#allocation2 + $0x8] sm:$0xff]  ;;  %v130_v22 = vld [vmem:[#allocation5 + $0x1f0] sm:$0xff]  ;;  %v131_v23 = vld [vmem:[#allocation5 + $0x1f8] sm:$0xff]  ;;  %337 = vmatprep.mubr.f32.mxu1 %v63_v21  ;;  %v856_v25 = vpack.c.bf16 %v113_v16, %v112_v15 }
  0x4b   :  { %819 = vmatprep.subr.bf16.mxu0 %v818_v0  ;;  %267 = vmatprep.mubr.f32.mxu0 %v61_v17  ;;  %v82_v27 = vld [vmem:[#allocation5 + $0x70] sm:$0xff]  ;;  %v83_v28 = vld [vmem:[#allocation5 + $0x78] sm:$0xff]  ;;  %v858_v30 = vpack.c.bf16 %v131_v23, %v130_v22  ;;  %v148_v32 = vld [vmem:[#allocation5 + $0x280] sm:$0xff] }
  0x4c   :  { %849 = vmatpush3.bf16.msra.mxu1 %v848_v63  ;;  %v114_v29 = vld [vmem:[#allocation5 + $0x170] sm:$0xff]  ;;  %v115_v31 = vld [vmem:[#allocation5 + $0x178] sm:$0xff]  ;;  %v149_v33 = vld [vmem:[#allocation5 + $0x288] sm:$0xff]  ;;  %v828_v36 = vpack.c.bf16 %v83_v28, %v82_v27 }
  0x4d   :  { %851 = vmatprep.subr.bf16.mxu1 %v850_v4  ;;  %v180_v34 = vld [vmem:[#allocation5 + $0x380] sm:$0xff]  ;;  %v181_v35 = vld [vmem:[#allocation5 + $0x388] sm:$0xff]  ;;  %v860_v37 = vpack.c.bf16 %v115_v31, %v114_v29  ;;  %v862_v38 = vpack.c.bf16 %v149_v33, %v148_v32  ;;  %v150_v44 = vld [vmem:[#allocation5 + $0x290] sm:$0xff] }
  0x4e   :  { %821 = vmatpush3.bf16.msra.mxu0 %v820_v10  ;;  %v132_v39 = vld [vmem:[#allocation5 + $0x200] sm:$0xff]  ;;  %v133_v40 = vld [vmem:[#allocation5 + $0x208] sm:$0xff]  ;;  %v894_v42 = vpack.c.bf16 %v181_v35, %v180_v34  ;;  %v151_v45 = vld [vmem:[#allocation5 + $0x298] sm:$0xff] }
  0x4f   :  { %823 = vmatprep.subr.bf16.mxu0 %v822_v14  ;;  %v164_v41 = vld [vmem:[#allocation5 + $0x300] sm:$0xff]  ;;  %v165_v43 = vld [vmem:[#allocation5 + $0x308] sm:$0xff]  ;;  %v182_v46 = vld [vmem:[#allocation5 + $0x390] sm:$0xff]  ;;  %v864_v49 = vpack.c.bf16 %v133_v40, %v132_v39  ;;  %v866_v52 = vpack.c.bf16 %v151_v45, %v150_v44 }
  0x50   :  { %853 = vmatpush3.bf16.msra.mxu1 %v852_v13  ;;  %v183_v47 = vld [vmem:[#allocation5 + $0x398] sm:$0xff]  ;;  %v60_v48 = vld [vmem:[#allocation2] sm:$0xff]  ;;  %v62_v50 = vld [vmem:[#allocation2 + $0x10] sm:$0xff]  ;;  %v896_v51 = vpack.c.bf16 %v165_v43, %v164_v41 }
  0x51   :  { %855 = vmatprep.subr.bf16.mxu1 %v854_v18  ;;  %v134_v53 = vld [vmem:[#allocation5 + $0x210] sm:$0xff]  ;;  %v135_v54 = vld [vmem:[#allocation5 + $0x218] sm:$0xff]  ;;  %v898_v56 = vpack.c.bf16 %v183_v47, %v182_v46  ;;  %v152_v58 = vld [vmem:[#allocation5 + $0x2a0] sm:$0xff] }
  0x52   :  { %825 = vmatpush3.bf16.msra.mxu0 %v824_v24  ;;  %v166_v55 = vld [vmem:[#allocation5 + $0x310] sm:$0xff]  ;;  %v167_v57 = vld [vmem:[#allocation5 + $0x318] sm:$0xff]  ;;  %v153_v59 = vld [vmem:[#allocation5 + $0x2a8] sm:$0xff]  ;;  %v868_v62 = vpack.c.bf16 %v135_v54, %v134_v53 }
  0x53   :  { %827 = vmatprep.subr.bf16.mxu0 %v826_v26  ;;  %v184_v60 = vld [vmem:[#allocation5 + $0x3a0] sm:$0xff]  ;;  %v185_v61 = vld [vmem:[#allocation5 + $0x3a8] sm:$0xff]  ;;  %v900_v63 = vpack.c.bf16 %v167_v57, %v166_v55  ;;  %v870_v0 = vpack.c.bf16 %v153_v59, %v152_v58  ;;  %v154_v6 = vld [vmem:[#allocation5 + $0x2b0] sm:$0xff] }
  0x54   :  { %857 = vmatpush3.bf16.msra.mxu1 %v856_v25  ;;  %v136_v1 = vld [vmem:[#allocation5 + $0x220] sm:$0xff]  ;;  %v137_v2 = vld [vmem:[#allocation5 + $0x228] sm:$0xff]  ;;  %v902_v4 = vpack.c.bf16 %v185_v61, %v184_v60  ;;  %v155_v7 = vld [vmem:[#allocation5 + $0x2b8] sm:$0xff] }
  0x55   :  { %859 = vmatprep.subr.bf16.mxu1 %v858_v30  ;;  %v168_v3 = vld [vmem:[#allocation5 + $0x320] sm:$0xff]  ;;  %v169_v5 = vld [vmem:[#allocation5 + $0x328] sm:$0xff]  ;;  %v186_v8 = vld [vmem:[#allocation5 + $0x3b0] sm:$0xff]  ;;  %v872_v10 = vpack.c.bf16 %v137_v2, %v136_v1  ;;  %v874_v12 = vpack.c.bf16 %v155_v7, %v154_v6 }
  0x56   :  { %829 = vmatpush3.bf16.msra.mxu0 %v828_v36  ;;  %v187_v9 = vld [vmem:[#allocation5 + $0x3b8] sm:$0xff]  ;;  %v904_v11 = vpack.c.bf16 %v169_v5, %v168_v3  ;;  %v138_v13 = vld [vmem:[#allocation5 + $0x230] sm:$0xff]  ;;  %v156_v18 = vld [vmem:[#allocation5 + $0x2c0] sm:$0xff] }
  0x57   :  { %863 = vmatprep.subr.bf16.mxu0 %v862_v38  ;;  %v139_v14 = vld [vmem:[#allocation5 + $0x238] sm:$0xff]  ;;  %v170_v15 = vld [vmem:[#allocation5 + $0x330] sm:$0xff]  ;;  %v906_v16 = vpack.c.bf16 %v187_v9, %v186_v8  ;;  %v157_v19 = vld [vmem:[#allocation5 + $0x2c8] sm:$0xff] }
  0x58   :  { %861 = vmatpush3.bf16.msra.mxu1 %v860_v37  ;;  %v171_v17 = vld [vmem:[#allocation5 + $0x338] sm:$0xff]  ;;  %v188_v20 = vld [vmem:[#allocation5 + $0x3c0] sm:$0xff]  ;;  %v189_v21 = vld [vmem:[#allocation5 + $0x3c8] sm:$0xff]  ;;  %v876_v22 = vpack.c.bf16 %v139_v14, %v138_v13  ;;  %v878_v26 = vpack.c.bf16 %v157_v19, %v156_v18 }
  0x59   :  { %895 = vmatprep.subr.bf16.mxu1 %v894_v42  ;;  %268 = vmatmul.mubr.f32.vlgmr.msra.gmra.mrb[0].mxu0 %v60_v48  ;;  %v65_v23 = vld [vmem:[#allocation2 + $0x28] sm:$0xff]  ;;  %v67_v24 = vld [vmem:[#allocation2 + $0x38] sm:$0xff]  ;;  %v908_v25 = vpack.c.bf16 %v171_v17, %v170_v15  ;;  %v140_v27 = vld [vmem:[#allocation5 + $0x240] sm:$0xff]  ;;  %v910_v30 = vpack.c.bf16 %v189_v21, %v188_v20 }
  0x5a   :  { %865 = vmatpush3.bf16.msra.mxu0 %v864_v49  ;;  %v141_v28 = vld [vmem:[#allocation5 + $0x248] sm:$0xff]  ;;  %v172_v29 = vld [vmem:[#allocation5 + $0x340] sm:$0xff]  ;;  %v158_v32 = vld [vmem:[#allocation5 + $0x2d0] sm:$0xff]  ;;  %407 = vmatprep.mubr.f32.mxu0 %v65_v23 }
  0x5b   :  { %338 = vmatmul.mubr.f32.vlgmr.msra.gmra.mrb[0].mxu1 %v62_v50  ;;  %867 = vmatprep.subr.bf16.mxu0 %v866_v52  ;;  %v173_v31 = vld [vmem:[#allocation5 + $0x348] sm:$0xff]  ;;  %v159_v33 = vld [vmem:[#allocation5 + $0x2d8] sm:$0xff]  ;;  %v190_v34 = vld [vmem:[#allocation5 + $0x3d0] sm:$0xff]  ;;  %v880_v36 = vpack.c.bf16 %v141_v28, %v140_v27 }
  0x5c   :  { %897 = vmatpush3.bf16.msra.mxu1 %v896_v51  ;;  %v191_v35 = vld [vmem:[#allocation5 + $0x3d8] sm:$0xff]  ;;  %477 = vmatprep.mubr.f32.mxu1 %v67_v24  ;;  %v912_v37 = vpack.c.bf16 %v173_v31, %v172_v29  ;;  %v882_v38 = vpack.c.bf16 %v159_v33, %v158_v32  ;;  %v142_v39 = vld [vmem:[#allocation5 + $0x250] sm:$0xff]  ;;  %v160_v44 = vld [vmem:[#allocation5 + $0x2e0] sm:$0xff]  ;;  %v1064_v33 = vmov 0.0  }
  0x5d   :  { %899 = vmatprep.subr.bf16.mxu1 %v898_v56  ;;  %v143_v40 = vld [vmem:[#allocation5 + $0x258] sm:$0xff]  ;;  %v174_v41 = vld [vmem:[#allocation5 + $0x350] sm:$0xff]  ;;  %v914_v42 = vpack.c.bf16 %v191_v35, %v190_v34  ;;  %v161_v45 = vld [vmem:[#allocation5 + $0x2e8] sm:$0xff] }
  0x5e   :  { %869 = vmatpush3.bf16.msra.mxu0 %v868_v62  ;;  %v175_v43 = vld [vmem:[#allocation5 + $0x358] sm:$0xff]  ;;  %v192_v46 = vld [vmem:[#allocation5 + $0x3e0] sm:$0xff]  ;;  %v193_v47 = vld [vmem:[#allocation5 + $0x3e8] sm:$0xff]  ;;  %v884_v48 = vpack.c.bf16 %v143_v40, %v142_v39  ;;  %v886_v50 = vpack.c.bf16 %v161_v45, %v160_v44 }
  0x5f   :  { %871 = vmatprep.subr.bf16.mxu0 %v870_v0  ;;  %v916_v49 = vpack.c.bf16 %v175_v43, %v174_v41  ;;  %v144_v51 = vld [vmem:[#allocation5 + $0x260] sm:$0xff]  ;;  %v145_v52 = vld [vmem:[#allocation5 + $0x268] sm:$0xff]  ;;  %v918_v54 = vpack.c.bf16 %v193_v47, %v192_v46  ;;  %v162_v56 = vld [vmem:[#allocation5 + $0x2f0] sm:$0xff] }
  0x60   :  { %901 = vmatpush3.bf16.msra.mxu1 %v900_v63  ;;  %v176_v53 = vld [vmem:[#allocation5 + $0x360] sm:$0xff]  ;;  %v177_v55 = vld [vmem:[#allocation5 + $0x368] sm:$0xff]  ;;  %v163_v57 = vld [vmem:[#allocation5 + $0x2f8] sm:$0xff]  ;;  %v888_v60 = vpack.c.bf16 %v145_v52, %v144_v51 }
  0x61   :  { %903 = vmatprep.subr.bf16.mxu1 %v902_v4  ;;  %v194_v58 = vld [vmem:[#allocation5 + $0x3f0] sm:$0xff]  ;;  %v195_v59 = vld [vmem:[#allocation5 + $0x3f8] sm:$0xff]  ;;  %v920_v61 = vpack.c.bf16 %v177_v55, %v176_v53  ;;  %v890_v62 = vpack.c.bf16 %v163_v57, %v162_v56  ;;  %v64_v6 = vld [vmem:[#allocation2 + $0x20] sm:$0xff] }
  0x62   :  { %873 = vmatpush3.bf16.msra.mxu0 %v872_v10  ;;  %v146_v63 = vld [vmem:[#allocation5 + $0x270] sm:$0xff]  ;;  %v147_v0 = vld [vmem:[#allocation5 + $0x278] sm:$0xff]  ;;  %v922_v1 = vpack.c.bf16 %v195_v59, %v194_v58  ;;  %v484_v8 = vld [vmem:[#allocation7] sm:$0xff] }
  0x63   :  { %875 = vmatprep.subr.bf16.mxu0 %v874_v12  ;;  %v178_v2 = vld [vmem:[#allocation5 + $0x370] sm:$0xff]  ;;  %v179_v3 = vld [vmem:[#allocation5 + $0x378] sm:$0xff]  ;;  %v892_v4 = vpack.c.bf16 %v147_v0, %v146_v63  ;;  %v485_v9 = vld [vmem:[#allocation7 + $0x8] sm:$0xff] }
  0x64   :  { %905 = vmatpush3.bf16.msra.mxu1 %v904_v11  ;;  %v924_v5 = vpack.c.bf16 %v179_v3, %v178_v2  ;;  %v66_v7 = vld [vmem:[#allocation2 + $0x30] sm:$0xff]  ;;  %v1062_v11 = vmov 0.0|0.0   ;;  %v927_v12 = vpack.c.bf16 %v485_v9, %v484_v8  ;;  %v487_v13 = vld [vmem:[#allocation7 + $0x18] sm:$0xff]  ;;  %v488_v15 = vld [vmem:[#allocation7 + $0x20] sm:$0xff] }
  0x65   :  { %907 = vmatprep.subr.bf16.mxu1 %v906_v16  ;;  %v486_v10 = vld [vmem:[#allocation7 + $0x10] sm:$0xff]  ;;  %v489_v16 = vld [vmem:[#allocation7 + $0x28] sm:$0xff]  ;;  %v491_v19 = vld [vmem:[#allocation7 + $0x38] sm:$0xff] }
  0x66   :  { %877 = vmatpush3.bf16.msra.mxu0 %v876_v22  ;;  %v930_v14 = vpack.c.bf16 %v487_v13, %v486_v10  ;;  %v933_v17 = vpack.c.bf16 %v489_v16, %v488_v15  ;;  %v490_v18 = vld [vmem:[#allocation7 + $0x30] sm:$0xff]  ;;  %v492_v21 = vld [vmem:[#allocation7 + $0x40] sm:$0xff]  ;;  %v493_v22 = vld [vmem:[#allocation7 + $0x48] sm:$0xff] }
  0x67   :  { %879 = vmatprep.subr.bf16.mxu0 %v878_v26  ;;  %v936_v20 = vpack.c.bf16 %v491_v19, %v490_v18  ;;  %v939_v23 = vpack.c.bf16 %v493_v22, %v492_v21  ;;  %v494_v24 = vld [vmem:[#allocation7 + $0x50] sm:$0xff]  ;;  %v496_v27 = vld [vmem:[#allocation7 + $0x60] sm:$0xff]  ;;  %v497_v28 = vld [vmem:[#allocation7 + $0x68] sm:$0xff] }
  0x68   :  { %909 = vmatpush3.bf16.msra.mxu1 %v908_v25  ;;  %v495_v25 = vld [vmem:[#allocation7 + $0x58] sm:$0xff]  ;;  %v945_v29 = vpack.c.bf16 %v497_v28, %v496_v27  ;;  %v604_v35 = vld [vmem:[%s1158_s2] ss:$0 sm:$0xff]  ;;  %s1065_s2 = smov [#allocation8]  }
  0x69   :  { %911 = vmatprep.subr.bf16.mxu1 %v910_v30  ;;  %v942_v26 = vpack.c.bf16 %v495_v25, %v494_v24  ;;  %v498_v30 = vld [vmem:[#allocation7 + $0x70] sm:$0xff]  ;;  %v499_v31 = vld [vmem:[#allocation7 + $0x78] sm:$0xff]  ;;  %v605_v52 = vld [vmem:[%s1160_s4] ss:$0 sm:$0xff]  ;;  %s594_s7 = sshll.u32 %s1065_s2, 4  ;;  %s595_s7 = int_to_ptr.vmem [resolvable:$true] %s594_s7 }
  0x6a   :  { %881 = vmatpush3.bf16.msra.mxu0 %v880_v36  ;;  %v948_v32 = vpack.c.bf16 %v499_v31, %v498_v30  ;;  %s1029_s4 = scalar_lea.vmem %s595_s7, 128  ;;  %p1034_p11 = scmp.lt.s32.totalorder %s595_s7, %s595_s7 }
  0x6b   :  { %883 = vmatprep.subr.bf16.mxu0 %v882_v38  ;;  %p1030_p10 = scmp.ne.s32.totalorder %s595_s7, %s1029_s4  ;;  %p1035_p12 = scmp.lt.s32.totalorder %s1029_s4, %s1029_s4 }
  0x6c   :  { %913 = vmatpush3.bf16.msra.mxu1 %v912_v37 }
  0x6d   :  { %915 = vmatprep.subr.bf16.mxu1 %v914_v42  ;;  %p1036_p13 = por %p1035_p12, %p1034_p11 }
  0x6e   :  { %885 = vmatpush3.bf16.msra.mxu0 %v884_v48 }
  0x6f   :  { %887 = vmatprep.subr.bf16.mxu0 %v886_v50  ;;  %p1037_p0 = pnand %p1036_p13, %p1030_p10 }
  0x70   :  { %917 = vmatpush3.bf16.msra.mxu1 %v916_v49 }
  0x71   :  { %919 = vmatprep.subr.bf16.mxu1 %v918_v54 }
  0x72   :  { %889 = vmatpush3.bf16.msra.mxu0 %v888_v60 }
  0x73   :  { %891 = vmatprep.subr.bf16.mxu0 %v890_v62 }
  0x74   :  { %921 = vmatpush3.bf16.msra.mxu1 %v920_v61 }
  0x75   :  { %923 = vmatprep.subr.bf16.mxu1 %v922_v1 }
  0x76   :  { %893 = vmatpush3.bf16.msra.mxu0 %v892_v4 }
  0x77   :  { %926 = vmatprep.subr.bf16.mxu0 %v1062_v11 }
  0x78   :  { %925 = vmatpush3.bf16.msra.mxu1 %v924_v5 }
  0x79   :  { %408 = vmatmul.mubr.f32.vlgmr.msra.gmra.mrb[2].mxu0 %v64_v6 }
  0x7a   :  { %928 = vmatpush3.bf16.msra.mxu0 %v927_v12  ;;  %795 = vmatprep.mubr.msk.f32.mxu0 %vm1063_vm0, %v1064_v33 }
  0x7b   :  { %478 = vmatmul.mubr.f32.vlgmr.msra.gmra.mrb[2].mxu1 %v66_v7  ;;  %929 = vmatprep.subr.bf16.mxu0 %v1062_v11 }
  0x7e   :  { %931 = vmatpush3.bf16.msra.mxu0 %v930_v14 }
  0x7f   :  { %932 = vmatprep.subr.bf16.mxu0 %v1062_v11 }
  0x82   :  { %934 = vmatpush3.bf16.msra.mxu0 %v933_v17 }
  0x83   :  { %935 = vmatprep.subr.bf16.mxu0 %v1062_v11 }
  0x86   :  { %937 = vmatpush3.bf16.msra.mxu0 %v936_v20 }
  0x87   :  { %938 = vmatprep.subr.bf16.mxu0 %v1062_v11 }
  0x8a   :  { %940 = vmatpush3.bf16.msra.mxu0 %v939_v23 }
  0x8b   :  { %941 = vmatprep.subr.bf16.mxu0 %v1062_v11 }
  0x8e   :  { %943 = vmatpush3.bf16.msra.mxu0 %v942_v26 }
  0x8f   :  { %944 = vmatprep.subr.bf16.mxu0 %v1062_v11 }
  0x92   :  { %946 = vmatpush3.bf16.msra.mxu0 %v945_v29 }
  0x93   :  { %947 = vmatprep.subr.bf16.mxu0 %v1062_v11 }
  0x96   :  { %949 = vmatpush3.bf16.msra.mxu0 %v948_v32 }
 0x12c   :  { %v638_v34 = vpop.f32.mrb[0].mxu0 }
 0x12d   :  { %v639_v36 = vpop.f32.mrb[1].mxu0 }
 0x12e   :  { %v673_v37 = vpop.f32.mrb[0].mxu1  ;;  %v640_v38 = vadd.f32 %v639_v36, %v638_v34 }
 0x12f   :  { %v674_v39 = vpop.f32.mrb[1].mxu1 }
 0x130   :  { %v675_v40 = vadd.f32 %v674_v39, %v673_v37  ;;  %v270_v41 = vadd.f32 %v640_v38, %v604_v35 }
 0x132   :  { %v340_v42 = vadd.f32 %v675_v40, %v270_v41 }
 0x14c   :  { %v708_v43 = vpop.f32.mrb[2].mxu0 }
 0x14d   :  { %v709_v44 = vpop.f32.mrb[3].mxu0 }
 0x14e   :  { %v743_v45 = vpop.f32.mrb[2].mxu1  ;;  %v710_v46 = vadd.f32 %v709_v44, %v708_v43 }
 0x14f   :  { %v744_v47 = vpop.f32.mrb[3].mxu1 }
 0x150   :  { %v745_v48 = vadd.f32 %v744_v47, %v743_v45  ;;  %v410_v49 = vadd.f32 %v710_v46, %v340_v42 }
 0x152   :  { %v480_v50 = vadd.f32 %v745_v48, %v410_v49 }
 0x154   :  { %v483_v51 = vmax.f32 %v480_v50, 0.0 }
 0x156   :  { %796 = vmatmul.mubr.f32.vlgmr.msra.gmra.mrb[4].mxu0 %v483_v51 }
 0x229   :  { %v573_v53 = vpop.f32.mrb[4].mxu0 }
 0x22a   :  { %v574_v54 = vadd.f32 %v605_v52, %v573_v53  ;;  %v797_v55 = vpop.f32.mrb[5].mxu0 }
 0x22c   :  { %577 = vmax.xlane.f32.xlu0 %v574_v54 }
 0x2b9   :  { %v578_v56 = vpop.xlane.xlu0 %577 }
 0x2ba   :  { %v579_v57 = vsub.f32 %v574_v54, %v578_v56 }
 0x2bc   :  { %v580_v58 = vmul.f32 1.442695, %v579_v57 }
 0x2be   :  { %959 = vpow2.f32 %v580_v58 }
 0x2c8   :  { %v960_v59 = vpop.eup %959 }
 0x2c9   :  { %582 = vadd.xlane.f32.xlu0 %v960_v59 }
 0x356   :  { %v583_v60 = vpop.xlane.xlu0 %582 }
 0x357   :  { %961 = vlog2.f32 %v583_v60 }
 0x361   :  { %v962_v61 = vpop.eup %961 }
 0x362   :  { %v585_v62 = vmul.f32 0.6931472, %v962_v61 }
 0x364   :  { %v586_v63 = vsub.f32 %v579_v57, %v585_v62 }
 0x366   :  { %587 = vst [vmem:[#allocation8] sm:$0xff] %v586_v63 }
 0x367   :  { %1040 = shalt.err (!%p1037_p0)
}
 0x368   :  { %s1041_s10 = scalar_lea.hbm %s1161_s5, 128 }
 0x369   :  { %p1042_p1 = scmp.ne.s32.totalorder %s1161_s5, %s1041_s10  ;;  %p1045_p2 = scmp.lt.u32.totalorder %s1041_s10, %s1161_s5 }
 0x36b   :  { %p1047_p3 = pnand %p1045_p2, %p1042_p1 }
 0x36d   :  { %1050 = shalt.err (!%p1047_p3)
}
 0x36e   :  { %597 = dma.vmem_to_hbm [thread:$0]  %s595_s7, 128, %s1161_s5, [#allocation4]  }
 0x36f   :  { %1055 = dma.done.wait [#allocation4], 128  }
 0x370   :  { %1056 = vsyncadd [#allocation4], 4294967168 }
 0x371   :  { %601 = vsyncpa [#allocation3], 1 }
 0x372   :  { %602 = vsyncpa [#allocation6], 1 }
 0x373   :  { %603 = vsyncpa [#allocation4], 1 }

</bundles_post_ra>
